<compile_context>
chip_gen: v5e
topology: v5e:2x2
jax: 0.10.0
libtpu: 0.0.40
codegen_flags: <defaults>
</compile_context>

<pallas_src>
import math

import jax
import jax.numpy as jnp
from jax.experimental import pallas as pl
from jax.experimental.pallas import tpu as pltpu


# ----------------------------------------------------------------------------
# Kernels
# ----------------------------------------------------------------------------
def _fgl_kron_kernel(x_ref, k_ref, b_ref, o_ref):
    # x_ref: (TB, n_in*in_c)         batch tile of flattened x
    # k_ref: (n_in*in_c, Nout_pad)   kron(A^T, W), resident across the grid
    # b_ref: (1, Nout_pad)           flattened bias (f32), resident
    # o_ref: (TB, Nout_pad)          lane-dense output tile
    y = jnp.dot(x_ref[...], k_ref[...], preferred_element_type=jnp.float32)
    o_ref[...] = (y + b_ref[...]).astype(o_ref.dtype)


def _fgl_slab_kernel(xt_ref, a_ref, w_ref, bias_ref, o_ref):
    # Large-graph fallback (two matmuls). NOTE: the inter-matmul reshape is a
    # sublane->lane relayout when out_c < 128; acceptable here because this
    # path is only taken when kron(A^T, W) cannot stay VMEM-resident.
    # xt_ref:   (n_in, TB, in_c)     batch tile of x, pre-transposed in wrapper
    # a_ref:    (n_out, n_in)        dense adjacency, resident
    # w_ref:    (in_c, out_c)        resident
    # bias_ref: (n_out, TB*out_c)    bias pre-tiled per batch column block (f32)
    # o_ref:    (n_out, TB*out_c)    lane-dense output slab
    n_in, tb, in_c = xt_ref.shape
    out_c = w_ref.shape[1]
    xw = jnp.dot(
        xt_ref[...].reshape(n_in * tb, in_c),
        w_ref[...],
        preferred_element_type=jnp.float32,
    )
    # bf16 path: intermediate is rounded to bf16 here (extra rounding vs the
    # Kron path); keeps the second matmul MXU-native.
    slab = xw.reshape(n_in, tb * out_c).astype(a_ref.dtype)
    y = jnp.dot(a_ref[...], slab, preferred_element_type=jnp.float32)
    o_ref[...] = (y + bias_ref[...]).astype(o_ref.dtype)


# ----------------------------------------------------------------------------
# Tiling helpers
# ----------------------------------------------------------------------------
def _pick_batch_tile(batch, quantum, bytes_per_row, resident_bytes, budget):
    """Largest TB (multiple of `quantum`) fitting the VMEM budget, while
    keeping >= 2 grid steps when the batch allows (v7x has 2 TensorCores)."""
    avail = budget - resident_bytes
    tb_budget = max(quantum, (avail // max(bytes_per_row, 1)) // quantum * quantum)
    if batch >= 2 * quantum:
        tb_cap = ((batch // 2) + quantum - 1) // quantum * quantum
    else:
        tb_cap = quantum
    tb = min(tb_budget, tb_cap)
    tb = min(tb, ((batch + quantum - 1) // quantum) * quantum)
    return max(quantum, tb)


# ----------------------------------------------------------------------------
# Wrapper
# ----------------------------------------------------------------------------
def fgl_forward(
    x,
    a_dense,
    weight,
    bias,
    *,
    compute_dtype=jnp.bfloat16,
    out_dtype=None,
    max_kron_bytes=8 * 1024 * 1024,
    vmem_budget_bytes=32 * 1024 * 1024,
):
    """out[b] = A @ x[b] @ W + bias, in large batch tiles on the MXU."""
    B, n_in, in_c = x.shape
    n_out, n_in_a = a_dense.shape
    in_c_w, out_c = weight.shape
    assert n_in_a == n_in and in_c_w == in_c

    compute_dtype = jnp.dtype(compute_dtype)
    out_dtype = jnp.dtype(out_dtype) if out_dtype is not None else jnp.dtype(x.dtype)
    in_item = compute_dtype.itemsize
    out_item = out_dtype.itemsize
    sublane = 16 if min(in_item, out_item) == 2 else 8

    vmem_limit = 48 * 1024 * 1024  # explicit; fits v7x's 64 MiB physical VMEM

    kin = n_in * in_c
    nout = n_out * out_c
    nout_p = -(-nout // 128) * 128          # lane-dense (multiple of 128) output
    kron_bytes = kin * nout_p * in_item

    # ---------------- Kron-fused path (primary) ----------------
    if kron_bytes <= max_kron_bytes:
        bytes_per_row = 2 * (kin * in_item + nout_p * out_item)   # x + out, 2x buffered
        resident = 2 * kron_bytes + 2 * nout_p * 4                # K + bias
        tb = _pick_batch_tile(B, sublane, bytes_per_row, resident, vmem_budget_bytes)
        b_pad = -(-B // tb) * tb

        xf = x.reshape(B, kin).astype(compute_dtype)              # free reshape, no transpose
        if b_pad != B:
            xf = jnp.pad(xf, ((0, b_pad - B), (0, 0)))

        # K[(n*in_c + c), (m*out_c + d)] = A[m, n] * W[c, d]  ==  kron(A^T, W).
        # Built in f32 (single rounding to compute_dtype).
        kmat = jnp.kron(a_dense.T.astype(jnp.float32), weight.astype(jnp.float32))
        bias_f = bias.reshape(1, nout).astype(jnp.float32)
        if nout_p != nout:
            kmat = jnp.pad(kmat, ((0, 0), (0, nout_p - nout)))
            bias_f = jnp.pad(bias_f, ((0, 0), (0, nout_p - nout)))
        kmat = kmat.astype(compute_dtype)

        out = pl.pallas_call(
            _fgl_kron_kernel,
            out_shape=jax.ShapeDtypeStruct((b_pad, nout_p), out_dtype),
            grid_spec=pltpu.PrefetchScalarGridSpec(
                num_scalar_prefetch=0,
                grid=(b_pad // tb,),
                in_specs=[
                    pl.BlockSpec((tb, kin), lambda i: (i, 0)),      # x batch tile
                    pl.BlockSpec((kin, nout_p), lambda i: (0, 0)),  # K (resident)
                    pl.BlockSpec((1, nout_p), lambda i: (0, 0)),    # bias (resident)
                ],
                out_specs=pl.BlockSpec((tb, nout_p), lambda i: (i, 0)),
            ),
            compiler_params=pltpu.CompilerParams(
                dimension_semantics=("parallel",),
                vmem_limit_bytes=vmem_limit,
            ),
        )(xf, kmat, bias_f)

        # Output is already batch-major: (B_pad, n_out*out_c) -> (B, n_out, out_c).
        return out[:B, :nout].reshape(B, n_out, out_c)

    # ---------------- Two-matmul slab fallback (large graphs) ----------------
    need = 128 // math.gcd(out_c, 128)                 # TB*out_c must be 128-multiple
    quantum = sublane * need // math.gcd(sublane, need)
    bytes_per_row = 2 * (n_in * in_c * in_item + nout * out_item + nout * 4)
    resident = 2 * (n_out * n_in + in_c * out_c) * in_item
    tb = _pick_batch_tile(B, quantum, bytes_per_row, resident, vmem_budget_bytes)
    b_pad = -(-B // tb) * tb

    xp = x if b_pad == B else jnp.pad(x, ((0, b_pad - B), (0, 0), (0, 0)))
    xt = jnp.transpose(xp, (1, 0, 2)).astype(compute_dtype)   # (n_in, B_pad, in_c)
    a_c = a_dense.astype(compute_dtype)
    w_c = weight.astype(compute_dtype)
    bias_slab = jnp.tile(bias.astype(jnp.float32), (1, tb))   # (n_out, tb*out_c)

    out = pl.pallas_call(
        _fgl_slab_kernel,
        out_shape=jax.ShapeDtypeStruct((n_out, b_pad * out_c), out_dtype),
        grid_spec=pltpu.PrefetchScalarGridSpec(
            num_scalar_prefetch=0,
            grid=(b_pad // tb,),
            in_specs=[
                pl.BlockSpec((n_in, tb, in_c), lambda i: (0, i, 0)),   # x tile
                pl.BlockSpec((n_out, n_in), lambda i: (0, 0)),         # A
                pl.BlockSpec((in_c, out_c), lambda i: (0, 0)),         # W
                pl.BlockSpec((n_out, tb * out_c), lambda i: (0, 0)),   # bias slab
            ],
            out_specs=pl.BlockSpec((n_out, tb * out_c), lambda i: (0, i)),
        ),
        compiler_params=pltpu.CompilerParams(
            dimension_semantics=("parallel",),
            vmem_limit_bytes=vmem_limit,
        ),
    )(xt, a_c, w_c, bias_slab)

    return out.reshape(n_out, b_pad, out_c).transpose(1, 0, 2)[:B]


# ----------------------------------------------------------------------------
# Self-test
# ----------------------------------------------------------------------------
if __name__ == "__main__":
    # Small, deterministic synthetic setup consistent with the module.
    B, n_in, n_out, in_c, out_c = 32, 16, 8, 8, 32

    key = jax.random.PRNGKey(0)
    k_mask, k_vals, k_w, k_b, k_x = jax.random.split(key, 5)

    # Deterministic "sparse" adjacency A (n_out, n_in): random mask * values,
    # used densely (block-diagonal spmm over the batch == per-batch matmul).
    mask = (jax.random.uniform(k_mask, (n_out, n_in)) < 0.3).astype(jnp.float32)
    vals = jax.random.normal(k_vals, (n_out, n_in), dtype=jnp.float32)
    a_dense = mask * vals

    # Parameters as in __init__: randn / n_out
    weight = jax.random.normal(k_w, (in_c, out_c), dtype=jnp.float32) / n_out
    bias = jax.random.normal(k_b, (n_out, out_c), dtype=jnp.float32) / n_out

    # Input x: (B, n_in, in_c)
    x = jax.random.normal(k_x, (B, n_in, in_c), dtype=jnp.float32)

    # Pure-JAX reference (same math as torch.spmm(...).mm(W).view(...) + bias).
    ref = jnp.einsum("oi,bic->boc", a_dense, x)
    ref = jnp.einsum("boc,cd->bod", ref, weight) + bias[None]

    # 1) Kron-fused path, f32 operands — strict tolerance.
    out_f32 = jax.block_until_ready(
        fgl_forward(x, a_dense, weight, bias, compute_dtype=jnp.float32)
    )
    assert out_f32.shape == (B, n_out, out_c)
    assert jnp.allclose(out_f32, ref, atol=1e-4, rtol=1e-4)

    # 2) Default path: bf16 operands (MXU-native), f32 accumulation, f32 out.
    out_bf16 = jax.block_until_ready(fgl_forward(x, a_dense, weight, bias))
    assert out_bf16.shape == (B, n_out, out_c)
    assert jnp.allclose(out_bf16, ref, atol=1e-1, rtol=1e-1)

    # 3) Large-graph fallback (two-matmul slab path), forced for coverage.
    out_fb = jax.block_until_ready(
        fgl_forward(x, a_dense, weight, bias, compute_dtype=jnp.float32,
                    max_kron_bytes=0)
    )
    assert out_fb.shape == (B, n_out, out_c)
    assert jnp.allclose(out_fb, ref, atol=1e-4, rtol=1e-4)

    print("KERNEL_OK")
</pallas_src>

<mosaic_0001>
module attributes {stable_mosaic.version = 11 : i64} {
  func.func @_fgl_kron_kernel(%arg0: i32, %arg1: memref<16x128xf32, #tpu.memory_space<vmem>>, %arg2: memref<128x256xf32, #tpu.memory_space<vmem>>, %arg3: memref<1x256xf32, #tpu.memory_space<vmem>>, %arg4: memref<16x256xf32, #tpu.memory_space<vmem>>) attributes {dimension_semantics = [#tpu.dimension_semantics<parallel>], iteration_bounds = array<i64: 2>, scalar_prefetch = 0 : i64, scratch_operands = 0 : i64, tpu.core_type = #tpu.core_type<tc>, window_params = [{transform_indices = @transform_0, window_bounds = array<i64: 16, 128>}, {pipeline_mode = #tpu.pipeline_mode<synchronous>, transform_indices = @transform_1, window_bounds = array<i64: 128, 256>}, {pipeline_mode = #tpu.pipeline_mode<synchronous>, transform_indices = @transform_2, window_bounds = array<i64: 1, 256>}, {transform_indices = @transform_3, window_bounds = array<i64: 16, 256>}]} {
    %c0 = arith.constant 0 : index
    %c0_0 = arith.constant 0 : index
    %0 = vector.load %arg1[%c0, %c0_0] : memref<16x128xf32, #tpu.memory_space<vmem>>, vector<16x128xf32>
    %c0_1 = arith.constant 0 : index
    %c0_2 = arith.constant 0 : index
    %1 = vector.load %arg2[%c0_1, %c0_2] : memref<128x256xf32, #tpu.memory_space<vmem>>, vector<128x256xf32>
    %cst = arith.constant dense<0.000000e+00> : vector<16x256xf32>
    %2 = tpu.matmul %0, %1, %cst {dimension_numbers = #tpu.dot_dimension_numbers<[1], [0], [0], [1], [0, 0, 1, 1], [], []>} : vector<16x128xf32>, vector<128x256xf32>, vector<16x256xf32> -> vector<16x256xf32>
    %c0_3 = arith.constant 0 : index
    %c0_4 = arith.constant 0 : index
    %3 = vector.load %arg3[%c0_3, %c0_4] : memref<1x256xf32, #tpu.memory_space<vmem>>, vector<1x256xf32>
    %4 = vector.broadcast %3 : vector<1x256xf32> to vector<16x256xf32>
    %5 = arith.addf %2, %4 : vector<16x256xf32>
    %c0_5 = arith.constant 0 : index
    %c0_6 = arith.constant 0 : index
    %6 = vector.load %arg4[%c0_5, %c0_6] : memref<16x256xf32, #tpu.memory_space<vmem>>, vector<16x256xf32>
    tpu.vector_store %arg4[%c0_5, %c0_6], %5 {strides = array<i32>} : memref<16x256xf32, #tpu.memory_space<vmem>>, vector<16x256xf32>,
    return
  }
  func.func @transform_0(%arg0: i32) -> (i32, i32) {
    %c0_i32 = arith.constant 0 : i32
    %c0_i32_0 = arith.constant 0 : i32
    return %arg0, %c0_i32 : i32, i32
  }
  func.func @transform_1(%arg0: i32) -> (i32, i32) {
    %c0_i32 = arith.constant 0 : i32
    %c0_i32_0 = arith.constant 0 : i32
    %c0_i32_1 = arith.constant 0 : i32
    return %c0_i32, %c0_i32_0 : i32, i32
  }
  func.func @transform_2(%arg0: i32) -> (i32, i32) {
    %c0_i32 = arith.constant 0 : i32
    %c0_i32_0 = arith.constant 0 : i32
    %c0_i32_1 = arith.constant 0 : i32
    return %c0_i32, %c0_i32_0 : i32, i32
  }
  func.func @transform_3(%arg0: i32) -> (i32, i32) {
    %c0_i32 = arith.constant 0 : i32
    %c0_i32_0 = arith.constant 0 : i32
    return %arg0, %c0_i32 : i32, i32
  }
}

</mosaic_0001>

<bundles_post_ra>
// kernel: tpu_custom_call.1
= control target key start
LH: loop header
LB: loop body
LE: loop exit
PB: predicated region body
PF: predicated region fallthrough
CT: control target
= control target key end

     0   :  { %8 = vsyncpa [#allocation3], 0  ;;  %s886_s0 = inlined_call_operand.hbm [shape: f32[32,128], index: 0, kind: input, shape index: {}]   ;;  %s887_s1 = inlined_call_operand.hbm [shape: f32[128,256], index: 1, kind: input, shape index: {}]   ;;  %s888_s2 = inlined_call_operand.hbm [shape: f32[1,256], index: 2, kind: input, shape index: {}]   ;;  %s889_s3 = inlined_call_operand.hbm [shape: f32[32,256], index: 3, kind: output, shape index: {}]  }
   0x1   :  { %10 = vsyncpa [#allocation3 + $0x1], 0 }
   0x2   :  { %11 = vsyncpa [#allocation6], 0 }
   0x3   :  { %12 = vsyncpa [#allocation4], 0 }
   0x4   :  { %14 = vsyncpa [#allocation4 + $0x1], 0  ;;  %s740_s12 = smov 0   ;;  %s742_s13 = smov 0  }
   0x5   :  { %s744_s14 = smov 0   ;;  %s746_s15 = smov 0  }
   0x6 LB: > { %s761_s16 = sadd.s32 4294967295, %s710_s15   ;;  %s423_s17 = sadd.s32 4294967294, %s710_s15   ;;  %s710_s15 = sphi %s746_s15, %s899_s15   ;;  %s706_s14 = sphi %s744_s14, %s898_s14   ;;  %s702_s13 = sphi %s742_s13, %s897_s13   ;;  %s698_s12 = sphi %s740_s12, %s896_s12  }
   0x7   : > { %p40_p0 = scmp.ne.s32.totalorder %s702_s13, %s698_s12  ;;  %p41_p1 = scmp.eq.s32.totalorder %s761_s16, 0 }
   0x8   : > { %p106_p2 = scmp.eq.s32.totalorder %s761_s16, 1  ;;  %p112_p3 = scmp.eq.s32.totalorder %s423_s17, 1 }
   0x9   : > { %p770_p4 = por %p41_p1, %p40_p0  ;;  %p424_p5 = scmp.ge.s32.totalorder %s710_s15, 1 }
   0xa   : > { %p775_p6 = por %p112_p3, %p40_p0  ;;  %p119_p7 = scmp.lt.s32.totalorder %s710_s15, 3 }
   0xb   : > { %s130_s22 = sshll.u32 %s887_s1, 4  ;;  %s712_s24 = smov [#allocation5]   ;;  %s131_s22 = int_to_ptr.hbm [resolvable:$true] %s130_s22 }
   0xc   : > { %p783_p8 = pnand %p424_p5, %p119_p7  ;;  %s132_s25 = sshll.u32 %s712_s24, 4  ;;  %s133_s25 = int_to_ptr.vmem [resolvable:$true] %s132_s25 }
   0xd   : > { %s145_s28 = sshll.u32 %s888_s2, 4  ;;  %s713_s29 = smov 256   ;;  %s146_s28 = int_to_ptr.hbm [resolvable:$true] %s145_s28 }
   0xe   : > { %p489_p9 = pneg %p783_p8  ;;  %s714_s30 = smov 16  }
   0xf   : > { %s715_s4 = smov [#allocation7]   ;;  %s796_s6 = sadd.s32 1, %s710_s15  }
  0x10   : > { %p490_p10 = pnand %p489_p9, %p41_p1  ;;  %s147_s5 = sshll.u32 %s715_s4, 4  ;;  %s148_s5 = int_to_ptr.vmem [resolvable:$true] %s147_s5 }
  0x11   : > { %s27_s7 = sadd.s32 1, %s706_s14  ;;  %s24_s8 = ssub.s32 %s710_s15, %s796_s6 }
  0x12   : > { %492 = dma.hbm_to_vmem [thread:$0]  (!%p490_p10), %s131_s22, 4096, %s133_s25, [#allocation6], %s713_s29, %s713_s29, %s714_s30  }
  0x13   : > { %495 = dma.hbm_to_vmem [thread:$0]  (!%p490_p10), %s146_s28, 32, %s148_s5, [#allocation6]  }
  0x14   : > { %p34_p12 = scmp.ne.s32.totalorder %s706_s14, %s702_s13  ;;  %p25_p13 = scmp.eq.s32.totalorder %s24_s8, 0 }
  0x15   : > { %p35_p0 = scmp.eq.s32.totalorder %s710_s15, 0  ;;  %p506_p5 = scmp.lt.s32.totalorder %s710_s15, 2 }
  0x16   : > { %p806_p3 = por %p106_p2, %p34_p12  ;;  %s158_s11 = sand.u32 1, %s706_s14  }
  0x17   : > { %s812_s10 = scalar_select %p25_p13, %s706_s14, %s27_s7  }
  0x18   : > { %p36_p7 = por %p35_p0, %p34_p12  ;;  %s428_s17 = sshll.u32 %s158_s11, 4 }
  0x19   : > { %s442_s20 = sshll.u32 %s710_s15, 4  ;;  %s162_s25 = scalar_lea.vmem [#allocation2], %s428_s17 }
  0x1a   : > { %s167_s24 = scalar_lea.hbm %s886_s0, %s442_s20  ;;  %s170_s26 = sshll.u32 %s162_s25, 4  ;;  %s171_s26 = int_to_ptr.vmem [resolvable:$true] %s170_s26 }
  0x1b   : > { %s168_s27 = sshll.u32 %s167_s24, 4  ;;  %p819_p2 = pnand %p506_p5, %p36_p7  ;;  %s169_s27 = int_to_ptr.hbm [resolvable:$true] %s168_s27 }
  0x1c   : > { %s159_s29 = scalar_lea.sflag [#allocation3], %s158_s11  ;;  %s610_s30 = sshra.s32 %s169_s27, 4  ;;  %s611_s30 = int_to_ptr.hbm [resolvable:$true] %s610_s30 }
  0x1d   : > { %s612_s4 = scalar_lea.hbm %s611_s30, 16  ;;  %p614_p10 = pneg %p819_p2 }
  0x1e   : > { %p613_p9 = scmp.ne.s32.totalorder %s611_s30, %s612_s4  ;;  %s617_s8 = scalar_lea.hbm %s886_s0, 32 }
  0x1f   : > { %p618_p0 = scmp.lt.s32.totalorder %s611_s30, %s886_s0  ;;  %p619_p5 = scmp.lt.s32.totalorder %s617_s8, %s612_s4 }
  0x20   : > { %p615_p12 = pnand %p614_p10, %p613_p9 }
  0x21   : > { %p620_p7 = por %p619_p5, %p618_p0 }
  0x22   : > { %p616_p13 = pneg %p615_p12 }
  0x24   : > { %p621_p11 = pnand %p620_p7, %p616_p13 }
  0x26   : > { %624 = shalt.err (!%p621_p11)
}
  0x27   : > { %s716_s11 = smov 128   ;;  %s717_s21 = smov 8  }
  0x28   : > { %499 = dma.hbm_to_vmem [thread:$0]  (!%p819_p2), %s169_s27, 256, %s171_s26, %s159_s29, %s716_s11, %s716_s11, %s717_s21  }
  0x29   : > { %182 = sbr.rel (%p783_p8) target bundleno = 220 (0xdc), region = 32  ;;  %s836_s22 = sand.u32 (!%p783_p8), 1, %s702_s13  }
  0x2a   : > { %s432_s24 = sshll.u32 (!%p783_p8), %s836_s22, 4  ;;  %s185_s25 = scalar_lea.sflag (!%p783_p8), [#allocation3], %s836_s22 }
  0x2b   : > { %s840_s30 = scalar_lea.vmem (!%p783_p8), [#allocation2], %s432_s24 }
  0x2e   : > { %685 = dma.done.wait (%p770_p4), %s185_s25, 256  }
  0x2f   : > { %687 = vsyncadd (%p770_p4), %s185_s25, 4294967040 }
  0x30   : > { %689 = dma.done.wait (%p41_p1), [#allocation6], 4128  }
  0x31   : > { %691 = vsyncadd (%p41_p1), [#allocation6], 4294963168  ;;  %v256_v0 = vld [vmem:[#allocation5 + $0xf0] sm:$0xff]  ;;  %v257_v1 = vld [vmem:[#allocation5 + $0xf8] sm:$0xff]  ;;  %s435_s18 = sshll.u32 %s836_s22, 5  ;;  %s444_s23 = sshll.u32 %s761_s16, 5 }
  0x32   : > { %v254_v2 = vld [vmem:[#allocation5 + $0xe0] sm:$0xff]  ;;  %445 = vmatpush.msra.mxu2 %v256_v0  ;;  %461 = vmatpush.msra.mxu3 %v257_v1  ;;  %v255_v3 = vld [vmem:[#allocation5 + $0xe8] sm:$0xff]  ;;  %v252_v4 = vld [vmem:[#allocation5 + $0xd0] sm:$0xff]  ;;  %s327_s28 = scalar_lea.hbm %s889_s3, %s444_s23  ;;  %s221_s29 = scalar_lea.vmem [#allocation8], %s435_s18 }
  0x33   : > { %v253_v5 = vld [vmem:[#allocation5 + $0xd8] sm:$0xff]  ;;  %264 = vmatpush.msra.mxu0 %v256_v0  ;;  %287 = vmatpush.msra.mxu1 %v257_v1  ;;  %v250_v6 = vld [vmem:[#allocation5 + $0xc0] sm:$0xff]  ;;  %v251_v7 = vld [vmem:[#allocation5 + $0xc8] sm:$0xff]  ;;  %s328_s4 = sshll.u32 %s221_s29, 4  ;;  %s330_s5 = sshll.u32 %s327_s28, 4  ;;  %s329_s4 = int_to_ptr.vmem [resolvable:$true] %s328_s4  ;;  %s331_s5 = int_to_ptr.hbm [resolvable:$true] %s330_s5 }
  0x34   : > { %446 = vmatpush.msra.mxu2 %v254_v2  ;;  %462 = vmatpush.msra.mxu3 %v255_v3  ;;  %v248_v8 = vld [vmem:[#allocation5 + $0xb0] sm:$0xff]  ;;  %v249_v9 = vld [vmem:[#allocation5 + $0xb8] sm:$0xff]  ;;  %v246_v10 = vld [vmem:[#allocation5 + $0xa0] sm:$0xff]  ;;  %s315_s16 = scalar_lea.sflag [#allocation4], %s836_s22  ;;  %s654_s7 = sshra.s32 %s331_s5, 4  ;;  %s655_s7 = int_to_ptr.hbm [resolvable:$true] %s654_s7 }
  0x35   : > { %265 = vmatpush.msra.mxu0 %v254_v2  ;;  %288 = vmatpush.msra.mxu1 %v255_v3  ;;  %v247_v11 = vld [vmem:[#allocation5 + $0xa8] sm:$0xff]  ;;  %v244_v12 = vld [vmem:[#allocation5 + $0x90] sm:$0xff]  ;;  %v245_v13 = vld [vmem:[#allocation5 + $0x98] sm:$0xff]  ;;  %s656_s8 = scalar_lea.hbm %s655_s7, 32  ;;  %s660_s11 = scalar_lea.hbm %s889_s3, 64 }
  0x36   : > { %447 = vmatpush.msra.mxu2 %v252_v4  ;;  %463 = vmatpush.msra.mxu3 %v253_v5  ;;  %v242_v14 = vld [vmem:[#allocation5 + $0x80] sm:$0xff]  ;;  %v243_v15 = vld [vmem:[#allocation5 + $0x88] sm:$0xff]  ;;  %v240_v16 = vld [vmem:[#allocation5 + $0x70] sm:$0xff]  ;;  %p657_p1 = scmp.ne.s32.totalorder %s655_s7, %s656_s8  ;;  %p661_p11 = scmp.lt.s32.totalorder %s655_s7, %s889_s3 }
  0x37   : > { %266 = vmatpush.msra.mxu0 %v252_v4  ;;  %289 = vmatpush.msra.mxu1 %v253_v5  ;;  %v241_v17 = vld [vmem:[#allocation5 + $0x78] sm:$0xff]  ;;  %v238_v18 = vld [vmem:[#allocation5 + $0x60] sm:$0xff]  ;;  %v239_v19 = vld [vmem:[#allocation5 + $0x68] sm:$0xff]  ;;  %p662_p2 = scmp.lt.s32.totalorder %s660_s11, %s656_s8 }
  0x38   : > { %448 = vmatpush.msra.mxu2 %v250_v6  ;;  %464 = vmatpush.msra.mxu3 %v251_v7  ;;  %v236_v20 = vld [vmem:[#allocation5 + $0x50] sm:$0xff]  ;;  %v237_v21 = vld [vmem:[#allocation5 + $0x58] sm:$0xff]  ;;  %v234_v22 = vld [vmem:[#allocation5 + $0x40] sm:$0xff]  ;;  %p658_p4 = pnand %p657_p1, %p806_p3 }
  0x39   : > { %267 = vmatpush.msra.mxu0 %v250_v6  ;;  %290 = vmatpush.msra.mxu1 %v251_v7  ;;  %v235_v23 = vld [vmem:[#allocation5 + $0x48] sm:$0xff]  ;;  %v232_v24 = vld [vmem:[#allocation5 + $0x30] sm:$0xff]  ;;  %v233_v25 = vld [vmem:[#allocation5 + $0x38] sm:$0xff]  ;;  %p663_p9 = por %p662_p2, %p661_p11 }
  0x3a   : > { %449 = vmatpush.msra.mxu2 %v248_v8  ;;  %465 = vmatpush.msra.mxu3 %v249_v9  ;;  %v230_v26 = vld [vmem:[#allocation5 + $0x20] sm:$0xff]  ;;  %v231_v27 = vld [vmem:[#allocation5 + $0x28] sm:$0xff]  ;;  %v228_v28 = vld [vmem:[#allocation5 + $0x10] sm:$0xff]  ;;  %p659_p8 = pneg %p658_p4 }
  0x3b   : > { %268 = vmatpush.msra.mxu0 %v248_v8  ;;  %291 = vmatpush.msra.mxu1 %v249_v9  ;;  %v229_v29 = vld [vmem:[#allocation5 + $0x18] sm:$0xff]  ;;  %v226_v30 = vld [vmem:[#allocation5] sm:$0xff]  ;;  %v227_v31 = vld [vmem:[#allocation5 + $0x8] sm:$0xff] }
  0x3c   : > { %450 = vmatpush.msra.mxu2 %v246_v10  ;;  %466 = vmatpush.msra.mxu3 %v247_v11  ;;  %v225_v32 = vld [vmem:[%s840_s30 + $0x8] sm:$0xff]  ;;  %v224_v33 = vld [vmem:[%s840_s30] sm:$0xff]  ;;  %p664_p10 = pnand %p663_p9, %p659_p8 }
  0x3d   : > { %269 = vmatpush.msra.mxu0 %v246_v10  ;;  %292 = vmatpush.msra.mxu1 %v247_v11  ;;  %v258_v34 = vld [vmem:[#allocation7] sm:$0x3] }
  0x3e   : > { %451 = vmatpush.msra.mxu2 %v244_v12  ;;  %467 = vmatpush.msra.mxu3 %v245_v13  ;;  %v260_v35 = vperm.slane %v258_v34, 0  ;;  %v261_v36 = vperm.slane %v258_v34, 1 }
  0x3f   : > { %270 = vmatpush.msra.mxu0 %v244_v12  ;;  %293 = vmatpush.msra.mxu1 %v245_v13 }
  0x40   : > { %452 = vmatpush.msra.mxu2 %v242_v14  ;;  %468 = vmatpush.msra.mxu3 %v243_v15 }
  0x41   : > { %271 = vmatpush.msra.mxu0 %v242_v14  ;;  %294 = vmatpush.msra.mxu1 %v243_v15 }
  0x42   : > { %453 = vmatpush.msra.mxu2 %v240_v16  ;;  %469 = vmatpush.msra.mxu3 %v241_v17 }
  0x43   : > { %272 = vmatpush.msra.mxu0 %v240_v16  ;;  %295 = vmatpush.msra.mxu1 %v241_v17 }
  0x44   : > { %454 = vmatpush.msra.mxu2 %v238_v18  ;;  %470 = vmatpush.msra.mxu3 %v239_v19 }
  0x45   : > { %273 = vmatpush.msra.mxu0 %v238_v18  ;;  %296 = vmatpush.msra.mxu1 %v239_v19 }
  0x46   : > { %455 = vmatpush.msra.mxu2 %v236_v20  ;;  %471 = vmatpush.msra.mxu3 %v237_v21 }
  0x47   : > { %274 = vmatpush.msra.mxu0 %v236_v20  ;;  %297 = vmatpush.msra.mxu1 %v237_v21 }
  0x48   : > { %456 = vmatpush.msra.mxu2 %v234_v22  ;;  %472 = vmatpush.msra.mxu3 %v235_v23 }
  0x49   : > { %275 = vmatpush.msra.mxu0 %v234_v22  ;;  %298 = vmatpush.msra.mxu1 %v235_v23 }
  0x4a   : > { %457 = vmatpush.msra.mxu2 %v232_v24  ;;  %473 = vmatpush.msra.mxu3 %v233_v25 }
  0x4b   : > { %276 = vmatpush.msra.mxu0 %v232_v24  ;;  %299 = vmatpush.msra.mxu1 %v233_v25 }
  0x4c   : > { %458 = vmatpush.msra.mxu2 %v230_v26  ;;  %474 = vmatpush.msra.mxu3 %v231_v27 }
  0x4d   : > { %277 = vmatpush.msra.mxu0 %v230_v26  ;;  %300 = vmatpush.msra.mxu1 %v231_v27 }
  0x4e   : > { %459 = vmatpush.msra.mxu2 %v228_v28  ;;  %475 = vmatpush.msra.mxu3 %v229_v29 }
  0x4f   : > { %278 = vmatpush.msra.mxu0 %v228_v28  ;;  %301 = vmatpush.msra.mxu1 %v229_v29 }
  0x50   : > { %460 = vmatpush.msra.mxu2 %v226_v30  ;;  %476 = vmatpush.msra.mxu3 %v227_v31 }
  0x51   : > { %283 = vmatmul.f32.vlgmr.msra.gmra.mxu2 %v225_v32  ;;  %306 = vmatmul.f32.vlgmr.msra.gmra.mxu3 %v225_v32 }
  0x52   : > { %279 = vmatpush.msra.mxu0 %v226_v30  ;;  %302 = vmatpush.msra.mxu1 %v227_v31 }
  0x53   : > { %280 = vmatmul.f32.vlgmr.msra.gmra.mxu0 %v224_v33  ;;  %303 = vmatmul.f32.vlgmr.msra.gmra.mxu1 %v224_v33 }
  0xd0   : > { %v281_v37 = vpop.f32.mrf.mxu0  ;;  %v304_v38 = vpop.f32.mrf.mxu1 }
  0xd1   : > { %v282_v39 = vadd.f32 %v281_v37, %v260_v35  ;;  %v305_v40 = vadd.f32 %v304_v38, %v261_v36 }
  0xd3   : > { %310 = vst [vmem:[%s221_s29] sm:$0xff] %v282_v39 }
  0xd4   : > { %v284_v41 = vpop.f32.mrf.mxu2  ;;  %311 = vst [vmem:[%s221_s29 + $0x8] sm:$0xff] %v305_v40  ;;  %v307_v42 = vpop.f32.mrf.mxu3 }
  0xd5   : > { %v285_v43 = vadd.f32 %v284_v41, %v260_v35  ;;  %v308_v44 = vadd.f32 %v307_v42, %v261_v36 }
  0xd7   : > { %312 = vst [vmem:[%s221_s29 + $0x10] sm:$0xff] %v285_v43 }
  0xd8   : > { %313 = vst [vmem:[%s221_s29 + $0x18] sm:$0xff] %v308_v44 }
  0xd9   : > { %667 = shalt.err (!%p664_p10)
}
  0xda   : > { %s718_s22 = smov 256   ;;  %s719_s25 = smov 16  }
  0xdb   : > { %487 = dma.vmem_to_hbm [thread:$0]  (%p806_p3), %s329_s4, 512, %s331_s5, %s315_s16, %s718_s22, %s718_s22, %s719_s25  }
  0xdc PF: > { %s345_s30 = sand.u32 1, %s698_s12   ;;  %p895_p12 = scmp.ge.s32.totalorder %s710_s15, 2 }
  0xdd   : > { %s346_s18 = scalar_lea.sflag [#allocation4], %s345_s30 }
  0xde   : > { %p501_p13 = pnand %p895_p12, %p775_p6 }
  0xe0   : > { %p502_p0 = pneg %p501_p13 }
  0xe2   : > { %693 = dma.done.wait (%p502_p0), %s346_s18, 512  }
  0xe3   : > { %695 = vsyncadd (%p502_p0), %s346_s18, 4294966784  ;;  %p17_p5 = scmp.ge.s32.totalorder %s796_s6, 4   ;;  %s896_s12 = smov %s702_s13 }
  0xe4   : > { %s897_s13 = smov %s706_s14  ;;  %s898_s14 = smov %s812_s10 }
  0xe5   : > { %s899_s15 = smov %s796_s6  ;;  %19 = sbr.rel (!%p17_p5) target bundleno = 6 (0x6), region = 85 }
  0xea   :  { %352 = vsyncpa [#allocation3], 1 }
  0xeb   :  { %354 = vsyncpa [#allocation3 + $0x1], 1 }
  0xec   :  { %355 = vsyncpa [#allocation6], 1 }
  0xed   :  { %356 = vsyncpa [#allocation4], 1 }
  0xee   :  { %358 = vsyncpa [#allocation4 + $0x1], 1 }

</bundles_post_ra>
